<compile_context>
chip_gen: v6e
topology: v6e:2x2x1
jax: 0.10.0
libtpu: 0.0.40
codegen_flags: <defaults>
</compile_context>

<pallas_src>
import functools

import jax
import jax.numpy as jnp
from jax.experimental import pallas as pl
from jax.experimental.pallas import tpu as pltpu

LANE = 128  # TPU vreg lane width.


def _round_up(n, m):
    return ((n + m - 1) // m) * m


def _linear_qnet_kernel(x_ref, w1_ref, b1_ref, w2_ref, b2_ref, o_ref):
    # First linear layer + bias + ReLU (MXU matmul, full-vreg VPU epilogue).
    h = jnp.dot(x_ref[...], w1_ref[...], preferred_element_type=jnp.float32)
    h = jnp.maximum(h + b1_ref[...], 0.0)
    # Second linear layer + bias. `h` never leaves VMEM.
    out = jnp.dot(h.astype(w2_ref.dtype), w2_ref[...],
                  preferred_element_type=jnp.float32)
    o_ref[...] = (out + b2_ref[...]).astype(o_ref.dtype)


@functools.partial(jax.jit, static_argnames=("tile_b",))
def linear_qnet_forward(x, w1, b1, w2, b2, *, tile_b=256):
    """Forward pass of LinearQNet.

    x:  [B, input_size]
    w1: [input_size, hidden]   b1: [1, hidden]
    w2: [hidden, output]       b2: [1, output]
    returns: [B, output]
    """
    B, in_dim = x.shape
    hid_dim = w1.shape[1]
    out_dim = w2.shape[1]
    dtype = x.dtype

    # Lane-dense padded sizes (zero padding is numerically exact).
    in_p = _round_up(in_dim, LANE)
    hid_p = _round_up(hid_dim, LANE)
    out_p = _round_up(out_dim, LANE)

    # Batch tiling: TILE_B rows per grid step (multiple of 8 for f32 sublanes).
    tb = min(tile_b, _round_up(B, 8))
    B_p = _round_up(B, tb)
    n_tiles = B_p // tb

    # Zero-pad everything once in the wrapper (XLA fuses these pads cheaply).
    x_p = jnp.pad(x, ((0, B_p - B), (0, in_p - in_dim)))
    w1_p = jnp.pad(w1, ((0, in_p - in_dim), (0, hid_p - hid_dim)))
    b1_p = jnp.pad(b1, ((0, 0), (0, hid_p - hid_dim)))
    w2_p = jnp.pad(w2, ((0, hid_p - hid_dim), (0, out_p - out_dim)))
    b2_p = jnp.pad(b2, ((0, 0), (0, out_p - out_dim)))

    bytes_in = (x_p.size + w1_p.size + b1_p.size + w2_p.size + b2_p.size
                ) * x_p.dtype.itemsize
    bytes_out = B_p * out_p * x_p.dtype.itemsize
    cost = pl.CostEstimate(
        flops=2 * B_p * (in_p * hid_p + hid_p * out_p),
        transcendentals=0,
        bytes_accessed=bytes_in + bytes_out,
    )

    vmem = pltpu.MemorySpace.VMEM
    out_padded = pl.pallas_call(
        _linear_qnet_kernel,
        out_shape=jax.ShapeDtypeStruct((B_p, out_p), dtype),
        grid=(n_tiles,),
        in_specs=[
            # Activations: one batch tile per grid step (double-buffered DMA).
            pl.BlockSpec((tb, in_p), lambda i: (i, 0), memory_space=vmem),
            # Weights / biases: same block every step -> VMEM-resident.
            pl.BlockSpec((in_p, hid_p), lambda i: (0, 0), memory_space=vmem),
            pl.BlockSpec((1, hid_p), lambda i: (0, 0), memory_space=vmem),
            pl.BlockSpec((hid_p, out_p), lambda i: (0, 0), memory_space=vmem),
            pl.BlockSpec((1, out_p), lambda i: (0, 0), memory_space=vmem),
        ],
        out_specs=pl.BlockSpec((tb, out_p), lambda i: (i, 0), memory_space=vmem),
        compiler_params=pltpu.CompilerParams(
            dimension_semantics=("parallel",),  # shards across TCs on v7x
        ),
        cost_estimate=cost,
    )(x_p, w1_p, b1_p, w2_p, b2_p)

    # Slice back to the logical (unpadded) output.
    return out_padded[:B, :out_dim]


def init_params(key, input_size, hidden_size, output_size, dtype=jnp.float32):
    """Deterministic synthetic init (uniform, PyTorch-Linear-style bounds)."""
    k1, k2, k3, k4 = jax.random.split(key, 4)
    bound1 = 1.0 / (input_size ** 0.5)
    bound2 = 1.0 / (hidden_size ** 0.5)
    w1 = jax.random.uniform(k1, (input_size, hidden_size), dtype,
                            minval=-bound1, maxval=bound1)
    b1 = jax.random.uniform(k2, (1, hidden_size), dtype,
                            minval=-bound1, maxval=bound1)
    w2 = jax.random.uniform(k3, (hidden_size, output_size), dtype,
                            minval=-bound2, maxval=bound2)
    b2 = jax.random.uniform(k4, (1, output_size), dtype,
                            minval=-bound2, maxval=bound2)
    return w1, b1, w2, b2


if __name__ == "__main__":
    # Snake-env-style sizes: 11 state features -> 32 hidden -> 3 actions.
    batch, input_size, hidden_size, output_size = 8, 11, 32, 3

    key = jax.random.PRNGKey(0)
    kx, kp = jax.random.split(key)
    x = jax.random.normal(kx, (batch, input_size), dtype=jnp.float32)
    w1, b1, w2, b2 = init_params(kp, input_size, hidden_size, output_size)

    out = linear_qnet_forward(x, w1, b1, w2, b2)
    out = jax.block_until_ready(out)

    # Pure-JAX reference check of forward-pass semantics.
    ref = jnp.maximum(x @ w1 + b1, 0.0) @ w2 + b2
    assert out.shape == (batch, output_size)
    assert jnp.allclose(out, ref, atol=1e-5, rtol=1e-5)

    # Also exercise a larger, non-tile-aligned replay-buffer-style batch.
    xb = jax.random.normal(jax.random.PRNGKey(1), (1000, input_size),
                           dtype=jnp.float32)
    out_b = jax.block_until_ready(linear_qnet_forward(xb, w1, b1, w2, b2))
    ref_b = jnp.maximum(xb @ w1 + b1, 0.0) @ w2 + b2
    assert out_b.shape == (1000, output_size)
    assert jnp.allclose(out_b, ref_b, atol=1e-4, rtol=1e-4)

    print("KERNEL_OK")
</pallas_src>

<mosaic_0001>
module attributes {stable_mosaic.version = 11 : i64} {
  func.func @_linear_qnet_kernel(%arg0: i32, %arg1: memref<8x128xf32, #tpu.memory_space<vmem>>, %arg2: memref<128x128xf32, #tpu.memory_space<vmem>>, %arg3: memref<1x128xf32, #tpu.memory_space<vmem>>, %arg4: memref<128x128xf32, #tpu.memory_space<vmem>>, %arg5: memref<1x128xf32, #tpu.memory_space<vmem>>, %arg6: memref<8x128xf32, #tpu.memory_space<vmem>>) attributes {dimension_semantics = [#tpu.dimension_semantics<parallel>], iteration_bounds = array<i64: 1>, scalar_prefetch = 0 : i64, scratch_operands = 0 : i64, tpu.core_type = #tpu.core_type<tc>, window_params = [{transform_indices = @transform_0, window_bounds = array<i64: 8, 128>}, {pipeline_mode = #tpu.pipeline_mode<synchronous>, transform_indices = @transform_1, window_bounds = array<i64: 128, 128>}, {pipeline_mode = #tpu.pipeline_mode<synchronous>, transform_indices = @transform_2, window_bounds = array<i64: 1, 128>}, {pipeline_mode = #tpu.pipeline_mode<synchronous>, transform_indices = @transform_3, window_bounds = array<i64: 128, 128>}, {pipeline_mode = #tpu.pipeline_mode<synchronous>, transform_indices = @transform_4, window_bounds = array<i64: 1, 128>}, {transform_indices = @transform_5, window_bounds = array<i64: 8, 128>}]} {
    %c0 = arith.constant 0 : index
    %c0_0 = arith.constant 0 : index
    %0 = vector.load %arg1[%c0, %c0_0] : memref<8x128xf32, #tpu.memory_space<vmem>>, vector<8x128xf32>
    %c0_1 = arith.constant 0 : index
    %c0_2 = arith.constant 0 : index
    %1 = vector.load %arg2[%c0_1, %c0_2] : memref<128x128xf32, #tpu.memory_space<vmem>>, vector<128x128xf32>
    %cst = arith.constant dense<0.000000e+00> : vector<8x128xf32>
    %2 = tpu.matmul %0, %1, %cst {dimension_numbers = #tpu.dot_dimension_numbers<[1], [0], [0], [1], [0, 0, 1, 1], [], []>} : vector<8x128xf32>, vector<128x128xf32>, vector<8x128xf32> -> vector<8x128xf32>
    %c0_3 = arith.constant 0 : index
    %c0_4 = arith.constant 0 : index
    %3 = vector.load %arg3[%c0_3, %c0_4] : memref<1x128xf32, #tpu.memory_space<vmem>>, vector<1x128xf32>
    %4 = vector.broadcast %3 : vector<1x128xf32> to vector<8x128xf32>
    %5 = arith.addf %2, %4 : vector<8x128xf32>
    %cst_5 = arith.constant 0.000000e+00 : f32
    %6 = vector.broadcast %cst_5 : f32 to vector<8x128xf32>
    %7 = arith.maximumf %5, %6 : vector<8x128xf32>
    %c0_6 = arith.constant 0 : index
    %c0_7 = arith.constant 0 : index
    %8 = vector.load %arg4[%c0_6, %c0_7] : memref<128x128xf32, #tpu.memory_space<vmem>>, vector<128x128xf32>
    %cst_8 = arith.constant dense<0.000000e+00> : vector<8x128xf32>
    %9 = tpu.matmul %7, %8, %cst_8 {dimension_numbers = #tpu.dot_dimension_numbers<[1], [0], [0], [1], [0, 0, 1, 1], [], []>} : vector<8x128xf32>, vector<128x128xf32>, vector<8x128xf32> -> vector<8x128xf32>
    %c0_9 = arith.constant 0 : index
    %c0_10 = arith.constant 0 : index
    %10 = vector.load %arg5[%c0_9, %c0_10] : memref<1x128xf32, #tpu.memory_space<vmem>>, vector<1x128xf32>
    %11 = vector.broadcast %10 : vector<1x128xf32> to vector<8x128xf32>
    %12 = arith.addf %9, %11 : vector<8x128xf32>
    %c0_11 = arith.constant 0 : index
    %c0_12 = arith.constant 0 : index
    %13 = vector.load %arg6[%c0_11, %c0_12] : memref<8x128xf32, #tpu.memory_space<vmem>>, vector<8x128xf32>
    tpu.vector_store %arg6[%c0_11, %c0_12], %12 {strides = array<i32>} : memref<8x128xf32, #tpu.memory_space<vmem>>, vector<8x128xf32>,
    return
  }
  func.func @transform_0(%arg0: i32) -> (i32, i32) {
    %c0_i32 = arith.constant 0 : i32
    %c0_i32_0 = arith.constant 0 : i32
    return %arg0, %c0_i32 : i32, i32
  }
  func.func @transform_1(%arg0: i32) -> (i32, i32) {
    %c0_i32 = arith.constant 0 : i32
    %c0_i32_0 = arith.constant 0 : i32
    %c0_i32_1 = arith.constant 0 : i32
    return %c0_i32, %c0_i32_0 : i32, i32
  }
  func.func @transform_2(%arg0: i32) -> (i32, i32) {
    %c0_i32 = arith.constant 0 : i32
    %c0_i32_0 = arith.constant 0 : i32
    %c0_i32_1 = arith.constant 0 : i32
    return %c0_i32, %c0_i32_0 : i32, i32
  }
  func.func @transform_3(%arg0: i32) -> (i32, i32) {
    %c0_i32 = arith.constant 0 : i32
    %c0_i32_0 = arith.constant 0 : i32
    %c0_i32_1 = arith.constant 0 : i32
    return %c0_i32, %c0_i32_0 : i32, i32
  }
  func.func @transform_4(%arg0: i32) -> (i32, i32) {
    %c0_i32 = arith.constant 0 : i32
    %c0_i32_0 = arith.constant 0 : i32
    %c0_i32_1 = arith.constant 0 : i32
    return %c0_i32, %c0_i32_0 : i32, i32
  }
  func.func @transform_5(%arg0: i32) -> (i32, i32) {
    %c0_i32 = arith.constant 0 : i32
    %c0_i32_0 = arith.constant 0 : i32
    return %arg0, %c0_i32 : i32, i32
  }
}

</mosaic_0001>

<bundles_post_ra>
// kernel: linear_qnet_forward.1
= control target key start
LH: loop header
LB: loop body
LE: loop exit
PB: predicated region body
PF: predicated region fallthrough
CT: control target
= control target key end

     0   :  { %v321_v0 = vmov 0.0   ;;  %vm322_vm0 = vmmov 0   ;;  %s495_s1 = inlined_call_operand.vmem [shape: f32[128,128], index: 1, kind: input, shape index: {}]   ;;  %s496_s3 = inlined_call_operand.vmem [shape: f32[128,128], index: 3, kind: input, shape index: {}]   ;;  %s497_s0 = inlined_call_operand.vmem [shape: f32[8,128], index: 0, kind: input, shape index: {}]   ;;  %s498_s2 = inlined_call_operand.vmem [shape: f32[1,128], index: 2, kind: input, shape index: {}]   ;;  %s499_s4 = inlined_call_operand.vmem [shape: f32[1,128], index: 4, kind: input, shape index: {}]   ;;  %s500_s5 = inlined_call_operand.vmem [shape: f32[8,128], index: 5, kind: output, shape index: {}]  }
   0x1   :  { %249 = vmatprep.subr.mxu0 %v321_v0  ;;  %v36_v1 = vld [vmem:[%s495_s1 + $0x78] sm:$0xff]  ;;  %v35_v2 = vld [vmem:[%s495_s1 + $0x70] sm:$0xff]  ;;  %281 = vmatprep.mubr.msk.f32.mxu0 %vm322_vm0, %v321_v0  ;;  %v34_v3 = vld [vmem:[%s495_s1 + $0x68] sm:$0xff] }
   0x2   :  { %250 = vmatpush3.msra.mxu0 %v36_v1  ;;  %284 = vmatprep.subr.mxu1 %v321_v0  ;;  %v33_v4 = vld [vmem:[%s495_s1 + $0x60] sm:$0xff]  ;;  %v130_v5 = vld [vmem:[%s496_s3 + $0x78] sm:$0xff]  ;;  %v129_v7 = vld [vmem:[%s496_s3 + $0x70] sm:$0xff] }
   0x3   :  { %251 = vmatprep.subr.mxu0 %v321_v0  ;;  %316 = vmatprep.mubr.msk.f32.mxu1 %vm322_vm0, %v321_v0  ;;  %v32_v6 = vld [vmem:[%s495_s1 + $0x58] sm:$0xff]  ;;  %v128_v8 = vld [vmem:[%s496_s3 + $0x68] sm:$0xff]  ;;  %v31_v9 = vld [vmem:[%s495_s1 + $0x50] sm:$0xff] }
   0x4   :  { %252 = vmatpush3.msra.mxu0 %v35_v2  ;;  %285 = vmatpush3.msra.mxu1 %v130_v5  ;;  %v127_v10 = vld [vmem:[%s496_s3 + $0x60] sm:$0xff]  ;;  %v30_v11 = vld [vmem:[%s495_s1 + $0x48] sm:$0xff]  ;;  %v126_v12 = vld [vmem:[%s496_s3 + $0x58] sm:$0xff] }
   0x5   :  { %253 = vmatprep.subr.mxu0 %v321_v0  ;;  %286 = vmatprep.subr.mxu1 %v321_v0  ;;  %v29_v13 = vld [vmem:[%s495_s1 + $0x40] sm:$0xff]  ;;  %v125_v14 = vld [vmem:[%s496_s3 + $0x50] sm:$0xff]  ;;  %v28_v15 = vld [vmem:[%s495_s1 + $0x38] sm:$0xff] }
   0x6   :  { %254 = vmatpush3.msra.mxu0 %v34_v3  ;;  %287 = vmatpush3.msra.mxu1 %v129_v7  ;;  %v124_v16 = vld [vmem:[%s496_s3 + $0x48] sm:$0xff]  ;;  %v27_v17 = vld [vmem:[%s495_s1 + $0x30] sm:$0xff]  ;;  %v123_v18 = vld [vmem:[%s496_s3 + $0x40] sm:$0xff] }
   0x7   :  { %255 = vmatprep.subr.mxu0 %v321_v0  ;;  %288 = vmatprep.subr.mxu1 %v321_v0  ;;  %v26_v19 = vld [vmem:[%s495_s1 + $0x28] sm:$0xff]  ;;  %v122_v20 = vld [vmem:[%s496_s3 + $0x38] sm:$0xff]  ;;  %v25_v21 = vld [vmem:[%s495_s1 + $0x20] sm:$0xff] }
   0x8   :  { %256 = vmatpush3.msra.mxu0 %v33_v4  ;;  %289 = vmatpush3.msra.mxu1 %v128_v8  ;;  %v121_v22 = vld [vmem:[%s496_s3 + $0x30] sm:$0xff]  ;;  %v24_v23 = vld [vmem:[%s495_s1 + $0x18] sm:$0xff]  ;;  %v120_v24 = vld [vmem:[%s496_s3 + $0x28] sm:$0xff] }
   0x9   :  { %257 = vmatprep.subr.mxu0 %v321_v0  ;;  %290 = vmatprep.subr.mxu1 %v321_v0  ;;  %v23_v25 = vld [vmem:[%s495_s1 + $0x10] sm:$0xff]  ;;  %v119_v26 = vld [vmem:[%s496_s3 + $0x20] sm:$0xff]  ;;  %v22_v27 = vld [vmem:[%s495_s1 + $0x8] sm:$0xff] }
   0xa   :  { %258 = vmatpush3.msra.mxu0 %v32_v6  ;;  %291 = vmatpush3.msra.mxu1 %v127_v10  ;;  %v118_v28 = vld [vmem:[%s496_s3 + $0x18] sm:$0xff]  ;;  %v21_v29 = vld [vmem:[%s495_s1] sm:$0xff]  ;;  %v117_v31 = vld [vmem:[%s496_s3 + $0x10] sm:$0xff] }
   0xb   :  { %259 = vmatprep.subr.mxu0 %v321_v0  ;;  %292 = vmatprep.subr.mxu1 %v321_v0  ;;  %v20_v30 = vld [vmem:[%s497_s0] sm:$0xff]  ;;  %v116_v32 = vld [vmem:[%s496_s3 + $0x8] sm:$0xff] }
   0xc   :  { %260 = vmatpush3.msra.mxu0 %v31_v9  ;;  %293 = vmatpush3.msra.mxu1 %v126_v12  ;;  %v115_v33 = vld [vmem:[%s496_s3] sm:$0xff] }
   0xd   :  { %261 = vmatprep.subr.mxu0 %v321_v0  ;;  %294 = vmatprep.subr.mxu1 %v321_v0  ;;  %v213_v34 = vld [vmem:[%s498_s2] ss:$0 sm:$0xff] }
   0xe   :  { %262 = vmatpush3.msra.mxu0 %v30_v11  ;;  %295 = vmatpush3.msra.mxu1 %v125_v14  ;;  %v214_v39 = vld [vmem:[%s499_s4] ss:$0 sm:$0xff] }
   0xf   :  { %263 = vmatprep.subr.mxu0 %v321_v0  ;;  %296 = vmatprep.subr.mxu1 %v321_v0 }
  0x10   :  { %264 = vmatpush3.msra.mxu0 %v29_v13  ;;  %297 = vmatpush3.msra.mxu1 %v124_v16 }
  0x11   :  { %265 = vmatprep.subr.mxu0 %v321_v0  ;;  %298 = vmatprep.subr.mxu1 %v321_v0 }
  0x12   :  { %266 = vmatpush3.msra.mxu0 %v28_v15  ;;  %299 = vmatpush3.msra.mxu1 %v123_v18 }
  0x13   :  { %267 = vmatprep.subr.mxu0 %v321_v0  ;;  %300 = vmatprep.subr.mxu1 %v321_v0 }
  0x14   :  { %268 = vmatpush3.msra.mxu0 %v27_v17  ;;  %301 = vmatpush3.msra.mxu1 %v122_v20 }
  0x15   :  { %269 = vmatprep.subr.mxu0 %v321_v0  ;;  %302 = vmatprep.subr.mxu1 %v321_v0 }
  0x16   :  { %270 = vmatpush3.msra.mxu0 %v26_v19  ;;  %303 = vmatpush3.msra.mxu1 %v121_v22 }
  0x17   :  { %271 = vmatprep.subr.mxu0 %v321_v0  ;;  %304 = vmatprep.subr.mxu1 %v321_v0 }
  0x18   :  { %272 = vmatpush3.msra.mxu0 %v25_v21  ;;  %305 = vmatpush3.msra.mxu1 %v120_v24 }
  0x19   :  { %273 = vmatprep.subr.mxu0 %v321_v0  ;;  %306 = vmatprep.subr.mxu1 %v321_v0 }
  0x1a   :  { %274 = vmatpush3.msra.mxu0 %v24_v23  ;;  %307 = vmatpush3.msra.mxu1 %v119_v26 }
  0x1b   :  { %275 = vmatprep.subr.mxu0 %v321_v0  ;;  %308 = vmatprep.subr.mxu1 %v321_v0 }
  0x1c   :  { %276 = vmatpush3.msra.mxu0 %v23_v25  ;;  %309 = vmatpush3.msra.mxu1 %v118_v28 }
  0x1d   :  { %277 = vmatprep.subr.mxu0 %v321_v0  ;;  %310 = vmatprep.subr.mxu1 %v321_v0 }
  0x1e   :  { %278 = vmatpush3.msra.mxu0 %v22_v27  ;;  %311 = vmatpush3.msra.mxu1 %v117_v31 }
  0x1f   :  { %279 = vmatprep.subr.mxu0 %v321_v0  ;;  %312 = vmatprep.subr.mxu1 %v321_v0 }
  0x20   :  { %280 = vmatpush3.msra.mxu0 %v21_v29  ;;  %313 = vmatpush3.msra.mxu1 %v116_v32 }
  0x21   :  { %282 = vmatmul.mubr.f32.vlgmr.msra.gmra.mxu0 %v20_v30  ;;  %314 = vmatprep.subr.mxu1 %v321_v0 }
  0x22   :  { %315 = vmatpush3.msra.mxu1 %v115_v33 }
  0xe1   :  { %v110_v35 = vpop.f32.mrf.mxu0 }
  0xe2   :  { %v111_v36 = vadd.f32 %v213_v34, %v110_v35 }
  0xe3   :  { %v283_v37 = vpop.f32.mrf.mxu0 }
  0xe4   :  { %v114_v38 = vmax.f32 %v111_v36, 0.0 }
  0xe6   :  { %317 = vmatmul.mubr.f32.vlgmr.msra.gmra.mxu1 %v114_v38 }
 0x1a6   :  { %v204_v40 = vpop.f32.mrf.mxu1 }
 0x1a7   :  { %v205_v41 = vadd.f32 %v214_v39, %v204_v40 }
 0x1a8   :  { %v318_v42 = vpop.f32.mrf.mxu1 }
 0x1a9   :  { %208 = vst [vmem:[%s500_s5] sm:$0xff] %v205_v41 }

</bundles_post_ra>
